<compile_context>
chip_gen: v7x
topology: tpu7x:2x2x1
jax: 0.10.0
libtpu: 0.0.40
codegen_flags: <defaults>
</compile_context>

<pallas_src>
from functools import partial
import math

import jax
import jax.numpy as jnp
from jax.experimental import pallas as pl
from jax.experimental.pallas import tpu as pltpu


def _pick_block_q(tq, tkv, num_heads, compute_itemsize):
    """Largest q-block that divides Tq, aligned for the compute dtype, sized so
    the live (H, block_q, Tkv) f32 score temporaries stay under ~24 MiB."""
    mult = 16 if compute_itemsize < 4 else 8
    target = 1024
    while target > 128 and 3 * num_heads * target * tkv * 4 > (24 << 20):
        target //= 2
    if tq <= target:
        return tq
    for bq in range(target, mult - 1, -1):
        if tq % bq == 0 and bq % mult == 0:
            return bq
    return tq  # full-extent fallback


def _derive_vmem_limit_bytes(block_q, tkv, d, dkq, dv, num_heads, c_isz):
    """Generation-aware VMEM limit derived from actual buffer sizes."""
    dbl = 2  # pallas double-buffers pipelined operands
    io_bytes = dbl * (block_q * d * c_isz                       # x block
                      + tkv * d * c_isz                         # kv slab
                      + block_q * d * 4                         # f32 output block
                      + d * 4                                   # bias
                      + (d * dkq + d * (dkq + dv) + dv * d) * c_isz)  # weights
    scratch_bytes = (block_q * dkq + tkv * (dkq + dv) + block_q * dv) * c_isz
    temp_bytes = (3 * num_heads * block_q * tkv * 4             # s / exp / probs
                  + (block_q * dkq + tkv * (dkq + dv)
                     + block_q * dv + block_q * d) * 4)         # projections / PV / y
    est = int(1.5 * (io_bytes + scratch_bytes + temp_bytes)) + (4 << 20)
    try:
        cap = int(0.625 * pltpu.get_tpu_info().vmem_capacity_bytes)
    except Exception:
        cap = 40 << 20  # conservative default (v7x: 64 MiB physical per TensorCore)
    return max(16 << 20, min(est, cap))


def _fused_mha_kernel(x_ref, kv_ref, wqT_ref, wkvT_ref, woT_ref, bo_ref, o_ref,
                      q_scr, k_scr, v_scr, attn_scr, *,
                      num_heads, dh_kq, dh_v, scale, causal):
    """One (batch, q-block) tile of the fused MHA forward.

    x_ref   : (1, block_q, D)      query input block
    kv_ref  : (1, Tkv, D)          key/value input slab for this batch
    wqT_ref : (D, Dkq)             q projection, pre-transposed (in, out)
    wkvT_ref: (D, Dkq + Dv)        merged k|v projection, pre-transposed
    woT_ref : (Dv, D)              out projection, pre-transposed
    bo_ref  : (1, D)               out projection bias (f32)
    o_ref   : (1, block_q, D)      final output block (f32)
    q_scr   : (H, block_q, dh_kq)  head-major Q staging
    k_scr   : (H, Tkv, dh_kq)      cached head-major K (per batch)
    v_scr   : (H, Tkv, dh_v)       cached head-major V (per batch)
    attn_scr: (block_q, Dv)        concatenated per-head attention output
    """
    tq = x_ref.shape[1]
    tkv = kv_ref.shape[1]
    dkq = num_heads * dh_kq

    # --- K/V projections: computed ONCE per batch (qi == 0), cached in VMEM ---
    @pl.when(pl.program_id(1) == 0)
    def _cache_kv():
        kvx = kv_ref[0]                                                 # (Tkv, D)
        kv_proj = jnp.dot(kvx, wkvT_ref[...],
                          preferred_element_type=jnp.float32)           # (Tkv, Dkq+Dv)
        # one-time restage to head-major (static slices -> single relayout/batch)
        for h in range(num_heads):
            k_scr[h] = kv_proj[:, h * dh_kq:(h + 1) * dh_kq].astype(k_scr.dtype)
            v_scr[h] = kv_proj[:, dkq + h * dh_v:dkq + (h + 1) * dh_v].astype(v_scr.dtype)

    # --- Q projection for this q-block, restaged head-major ---
    x = x_ref[0]                                                        # (tq, D)
    q_all = jnp.dot(x, wqT_ref[...], preferred_element_type=jnp.float32)  # (tq, Dkq)
    for h in range(num_heads):
        q_scr[h] = q_all[:, h * dh_kq:(h + 1) * dh_kq].astype(q_scr.dtype)

    q_h = q_scr[...]            # (H, tq,  dh_kq)
    k_h = k_scr[...]            # (H, Tkv, dh_kq)
    v_h = v_scr[...]            # (H, Tkv, dh_v)

    # --- all-head attention scores (batched MXU matmul, f32 accumulate) ---
    s = jnp.einsum('hqd,hkd->hqk', q_h, k_h,
                   preferred_element_type=jnp.float32) * scale          # (H, tq, Tkv)
    if causal:
        q_off = pl.program_id(1) * tq
        row = jax.lax.broadcasted_iota(jnp.int32, (1, tq, tkv), 1) + q_off
        col = jax.lax.broadcasted_iota(jnp.int32, (1, tq, tkv), 2)
        s = jnp.where(col > row, jnp.float32(-1e30), s)  # finite mask: NaN-safe

    # --- softmax in f32 (VPU/EUP); approx reciprocal + one Newton step ---
    m = jnp.max(s, axis=-1, keepdims=True)
    p = jnp.exp(s - m)
    denom = jnp.sum(p, axis=-1, keepdims=True)
    r = pl.reciprocal(denom, approx=True)
    r = r * (2.0 - denom * r)
    probs = (p * r).astype(v_h.dtype)
    # TODO(synk): nn.Dropout on attn_probs omitted (eval-mode / inference identity).

    # --- PV (batched), concat heads, then ONE full-contraction output proj ---
    o_h = jnp.einsum('hqk,hkd->hqd', probs, v_h,
                     preferred_element_type=jnp.float32)                # (H, tq, dh_v)
    for h in range(num_heads):
        attn_scr[:, h * dh_v:(h + 1) * dh_v] = o_h[h].astype(attn_scr.dtype)

    y = jnp.dot(attn_scr[...], woT_ref[...],
                preferred_element_type=jnp.float32) + bo_ref[...]
    o_ref[0] = y.astype(o_ref.dtype)


def parallel_mha_modified(x, kv, wq, wk, wv, wo, bo, *, num_heads, causal=False,
                          mxu_dtype=jnp.bfloat16):
    """Pallas implementation of ParallelMHA_Modified.forward (inference).

    x : (B, Tq, D); kv: (B, Tkv, D) or None (self-attention).
    wq, wk: (Dkq, D); wv: (Dv, D); wo: (D, Dv); bo: (D,)  (PyTorch (out, in)).
    mxu_dtype: MXU operand dtype (default bf16, f32 accumulate). None => pure f32.
    """
    if kv is None:
        kv = x
    B, Tq, D = x.shape
    Tkv = kv.shape[1]
    Dkq = wq.shape[0]
    Dv = wv.shape[0]
    assert Dkq % num_heads == 0 and Dv % num_heads == 0
    dh_kq = Dkq // num_heads
    dh_v = Dv // num_heads

    cdt = jnp.dtype(mxu_dtype) if mxu_dtype is not None else jnp.dtype(jnp.float32)
    apply_causal = bool(causal) and (Tq == Tkv)
    scale = 1.0 / math.sqrt(dh_kq)
    block_q = _pick_block_q(Tq, Tkv, num_heads, cdt.itemsize)
    n_qb = Tq // block_q

    # One-time host-side transposes/merges so the kernel does natural (M,K)x(K,N)
    # matmuls and the K/V projections share a single MXU call.
    wqT = wq.T.astype(cdt)                                        # (D, Dkq)
    wkvT = jnp.concatenate([wk.T, wv.T], axis=1).astype(cdt)      # (D, Dkq+Dv)
    woT = wo.T.astype(cdt)                                        # (Dv, D)
    bo2 = bo.reshape(1, D).astype(jnp.float32)
    xc = x.astype(cdt)
    kvc = kv.astype(cdt)

    kernel = partial(_fused_mha_kernel, num_heads=num_heads, dh_kq=dh_kq,
                     dh_v=dh_v, scale=scale, causal=apply_causal)

    vmem_limit = _derive_vmem_limit_bytes(block_q, Tkv, D, Dkq, Dv, num_heads,
                                          cdt.itemsize)

    out = pl.pallas_call(
        kernel,
        out_shape=jax.ShapeDtypeStruct((B, Tq, D), jnp.float32),
        grid=(B, n_qb),
        in_specs=[
            pl.BlockSpec((1, block_q, D), lambda b, qi: (b, qi, 0)),
            pl.BlockSpec((1, Tkv, D), lambda b, qi: (b, 0, 0)),
            # Loop-invariant weights/bias: constant index maps, so they are only
            # DMA'd once; their double-buffer VMEM cost is small next to scratch.
            pl.BlockSpec((D, Dkq), lambda b, qi: (0, 0)),
            pl.BlockSpec((D, Dkq + Dv), lambda b, qi: (0, 0)),
            pl.BlockSpec((Dv, D), lambda b, qi: (0, 0)),
            pl.BlockSpec((1, D), lambda b, qi: (0, 0)),
        ],
        out_specs=pl.BlockSpec((1, block_q, D), lambda b, qi: (b, qi, 0)),
        scratch_shapes=[
            pltpu.VMEM((num_heads, block_q, dh_kq), cdt),   # head-major Q staging
            pltpu.VMEM((num_heads, Tkv, dh_kq), cdt),       # cached head-major K
            pltpu.VMEM((num_heads, Tkv, dh_v), cdt),        # cached head-major V
            pltpu.VMEM((block_q, Dv), cdt),                 # concatenated attn out
        ],
        compiler_params=pltpu.CompilerParams(
            # qi must stay sequential per batch for the K/V cache; batch axis is
            # the only one sharded across TensorCores.
            dimension_semantics=("parallel", "arbitrary"),
            vmem_limit_bytes=vmem_limit),
    )(xc, kvc, wqT, wkvT, woT, bo2)

    return out


def _reference(x, kv, wq, wk, wv, wo, bo, num_heads, causal=False):
    """Pure-JAX f32 reference mirroring the PyTorch forward (eval mode)."""
    if kv is None:
        kv = x
    B, Tq, D = x.shape
    Tkv = kv.shape[1]
    dh_kq = wq.shape[0] // num_heads
    dh_v = wv.shape[0] // num_heads
    q = (x @ wq.T).reshape(B, Tq, num_heads, dh_kq).transpose(0, 2, 1, 3)
    k = (kv @ wk.T).reshape(B, Tkv, num_heads, dh_kq).transpose(0, 2, 1, 3)
    v = (kv @ wv.T).reshape(B, Tkv, num_heads, dh_v).transpose(0, 2, 1, 3)
    s = jnp.einsum("bhqd,bhkd->bhqk", q, k) / math.sqrt(dh_kq)
    if causal and Tq == Tkv:
        mask = jnp.triu(jnp.full((Tq, Tkv), -jnp.inf), k=1)
        s = s + mask[None, None]
    p = jax.nn.softmax(s, axis=-1)
    o = jnp.einsum("bhqk,bhkd->bhqd", p, v)
    o = o.transpose(0, 2, 1, 3).reshape(B, Tq, num_heads * dh_v)
    return o @ wo.T + bo


if __name__ == "__main__":
    # Shapes consistent with the module: input_dim=32, num_heads=4 -> dh = 8.
    B, T, D = 2, 8, 32
    Tkv_cross = 16
    num_heads = 4

    key = jax.random.PRNGKey(0)
    kx, kkv, kq, kk, kv_, kwo, kbo = jax.random.split(key, 7)

    x = jax.random.normal(kx, (B, T, D), dtype=jnp.float32)
    kv_in = jax.random.normal(kkv, (B, Tkv_cross, D), dtype=jnp.float32)

    # Deterministic parameter init (shapes from nn.Linear: (out, in)).
    bound = 1.0 / math.sqrt(D)
    wq = jax.random.uniform(kq, (D, D), minval=-bound, maxval=bound, dtype=jnp.float32)
    wk = jax.random.uniform(kk, (D, D), minval=-bound, maxval=bound, dtype=jnp.float32)
    wv = jax.random.uniform(kv_, (D, D), minval=-bound, maxval=bound, dtype=jnp.float32)
    wo = jax.random.uniform(kwo, (D, D), minval=-bound, maxval=bound, dtype=jnp.float32)
    bo = jax.random.uniform(kbo, (D,), minval=-bound, maxval=bound, dtype=jnp.float32)

    # 1) self-attention, non-causal, f32 MXU operands (exact-ish check)
    out = parallel_mha_modified(x, None, wq, wk, wv, wo, bo,
                                num_heads=num_heads, causal=False, mxu_dtype=None)
    out = jax.block_until_ready(out)
    ref = _reference(x, None, wq, wk, wv, wo, bo, num_heads, causal=False)
    assert out.shape == (B, T, D)
    assert jnp.allclose(out, ref, atol=1e-3, rtol=1e-3), "mismatch (self, non-causal, f32)"

    # 2) self-attention, causal, f32 MXU operands
    out_c = parallel_mha_modified(x, None, wq, wk, wv, wo, bo,
                                  num_heads=num_heads, causal=True, mxu_dtype=None)
    out_c = jax.block_until_ready(out_c)
    ref_c = _reference(x, None, wq, wk, wv, wo, bo, num_heads, causal=True)
    assert jnp.allclose(out_c, ref_c, atol=1e-3, rtol=1e-3), "mismatch (self, causal, f32)"

    # 3) cross-attention (kv != x); causal flag is a no-op since Tq != Tkv
    out_x = parallel_mha_modified(x, kv_in, wq, wk, wv, wo, bo,
                                  num_heads=num_heads, causal=True, mxu_dtype=None)
    out_x = jax.block_until_ready(out_x)
    ref_x = _reference(x, kv_in, wq, wk, wv, wo, bo, num_heads, causal=True)
    assert jnp.allclose(out_x, ref_x, atol=1e-3, rtol=1e-3), "mismatch (cross, f32)"

    # 4) default path: bf16 MXU operands (f32 accumulate / f32 softmax)
    out_bf = parallel_mha_modified(x, None, wq, wk, wv, wo, bo,
                                   num_heads=num_heads, causal=True)
    out_bf = jax.block_until_ready(out_bf)
    assert jnp.allclose(out_bf, ref_c, atol=5e-2, rtol=5e-2), "mismatch (self, causal, bf16)"

    print("KERNEL_OK")
</pallas_src>

<mosaic_0001>
module attributes {stable_mosaic.version = 11 : i64} {
  func.func @_fused_mha_kernel(%arg0: i32, %arg1: i32, %arg2: memref<1x8x32xf32, #tpu.memory_space<vmem>>, %arg3: memref<1x8x32xf32, #tpu.memory_space<vmem>>, %arg4: memref<32x32xf32, #tpu.memory_space<vmem>>, %arg5: memref<32x64xf32, #tpu.memory_space<vmem>>, %arg6: memref<32x32xf32, #tpu.memory_space<vmem>>, %arg7: memref<1x32xf32, #tpu.memory_space<vmem>>, %arg8: memref<1x8x32xf32, #tpu.memory_space<vmem>>, %arg9: memref<4x8x8xf32, #tpu.memory_space<vmem>>, %arg10: memref<4x8x8xf32, #tpu.memory_space<vmem>>, %arg11: memref<4x8x8xf32, #tpu.memory_space<vmem>>, %arg12: memref<8x32xf32, #tpu.memory_space<vmem>>) attributes {dimension_semantics = [#tpu.dimension_semantics<parallel>, #tpu.dimension_semantics<arbitrary>], iteration_bounds = array<i64: 2, 1>, scalar_prefetch = 0 : i64, scratch_operands = 4 : i64, tpu.core_type = #tpu.core_type<tc>, window_params = [{transform_indices = @transform_0, window_bounds = array<i64: 1, 8, 32>}, {transform_indices = @transform_1, window_bounds = array<i64: 1, 8, 32>}, {pipeline_mode = #tpu.pipeline_mode<synchronous>, transform_indices = @transform_2, window_bounds = array<i64: 32, 32>}, {pipeline_mode = #tpu.pipeline_mode<synchronous>, transform_indices = @transform_3, window_bounds = array<i64: 32, 64>}, {pipeline_mode = #tpu.pipeline_mode<synchronous>, transform_indices = @transform_4, window_bounds = array<i64: 32, 32>}, {pipeline_mode = #tpu.pipeline_mode<synchronous>, transform_indices = @transform_5, window_bounds = array<i64: 1, 32>}, {transform_indices = @transform_6, window_bounds = array<i64: 1, 8, 32>}]} {
    %c0_i32 = arith.constant 0 : i32
    %0 = arith.cmpi eq, %arg1, %c0_i32 : i32
    %1 = arith.extui %0 : i1 to i32
    %c0_i32_0 = arith.constant 0 : i32
    %2 = arith.cmpi ne, %1, %c0_i32_0 : i32
    scf.if %2 {
      %c0_44 = arith.constant 0 : index
      %c0_45 = arith.constant 0 : index
      %c0_46 = arith.constant 0 : index
      %65 = vector.load %arg3[%c0_44, %c0_45, %c0_46] : memref<1x8x32xf32, #tpu.memory_space<vmem>>, vector<1x8x32xf32>
      %66 = vector.shape_cast %65 : vector<1x8x32xf32> to vector<8x32xf32>
      %c0_47 = arith.constant 0 : index
      %c0_48 = arith.constant 0 : index
      %67 = vector.load %arg5[%c0_47, %c0_48] : memref<32x64xf32, #tpu.memory_space<vmem>>, vector<32x64xf32>
      %cst_49 = arith.constant dense<0.000000e+00> : vector<8x64xf32>
      %68 = tpu.matmul %66, %67, %cst_49 {dimension_numbers = #tpu.dot_dimension_numbers<[1], [0], [0], [1], [0, 0, 1, 1], [], []>} : vector<8x32xf32>, vector<32x64xf32>, vector<8x64xf32> -> vector<8x64xf32>
      %69 = vector.extract_strided_slice %68 {offsets = [0, 0], sizes = [8, 8], strides = [1, 1]} : vector<8x64xf32> to vector<8x8xf32>
      %c0_50 = arith.constant 0 : index
      %c0_51 = arith.constant 0 : index
      %c0_52 = arith.constant 0 : index
      %70 = vector.load %arg10[%c0_50, %c0_51, %c0_52] : memref<4x8x8xf32, #tpu.memory_space<vmem>>, vector<1x8x8xf32>
      %71 = vector.shape_cast %70 : vector<1x8x8xf32> to vector<8x8xf32>
      %72 = vector.shape_cast %69 : vector<8x8xf32> to vector<1x8x8xf32>
      tpu.vector_store %arg10[%c0_50, %c0_51, %c0_52], %72 {strides = array<i32>} : memref<4x8x8xf32, #tpu.memory_space<vmem>>, vector<1x8x8xf32>,
      %73 = vector.extract_strided_slice %68 {offsets = [0, 32], sizes = [8, 8], strides = [1, 1]} : vector<8x64xf32> to vector<8x8xf32>
      %c0_53 = arith.constant 0 : index
      %c0_54 = arith.constant 0 : index
      %c0_55 = arith.constant 0 : index
      %74 = vector.load %arg11[%c0_53, %c0_54, %c0_55] : memref<4x8x8xf32, #tpu.memory_space<vmem>>, vector<1x8x8xf32>
      %75 = vector.shape_cast %74 : vector<1x8x8xf32> to vector<8x8xf32>
      %76 = vector.shape_cast %73 : vector<8x8xf32> to vector<1x8x8xf32>
      tpu.vector_store %arg11[%c0_53, %c0_54, %c0_55], %76 {strides = array<i32>} : memref<4x8x8xf32, #tpu.memory_space<vmem>>, vector<1x8x8xf32>,
      %77 = vector.extract_strided_slice %68 {offsets = [0, 8], sizes = [8, 8], strides = [1, 1]} : vector<8x64xf32> to vector<8x8xf32>
      %c1_56 = arith.constant 1 : index
      %c0_57 = arith.constant 0 : index
      %c0_58 = arith.constant 0 : index
      %78 = vector.load %arg10[%c1_56, %c0_57, %c0_58] : memref<4x8x8xf32, #tpu.memory_space<vmem>>, vector<1x8x8xf32>
      %79 = vector.shape_cast %78 : vector<1x8x8xf32> to vector<8x8xf32>
      %80 = vector.shape_cast %77 : vector<8x8xf32> to vector<1x8x8xf32>
      tpu.vector_store %arg10[%c1_56, %c0_57, %c0_58], %80 {strides = array<i32>} : memref<4x8x8xf32, #tpu.memory_space<vmem>>, vector<1x8x8xf32>,
      %81 = vector.extract_strided_slice %68 {offsets = [0, 40], sizes = [8, 8], strides = [1, 1]} : vector<8x64xf32> to vector<8x8xf32>
      %c1_59 = arith.constant 1 : index
      %c0_60 = arith.constant 0 : index
      %c0_61 = arith.constant 0 : index
      %82 = vector.load %arg11[%c1_59, %c0_60, %c0_61] : memref<4x8x8xf32, #tpu.memory_space<vmem>>, vector<1x8x8xf32>
      %83 = vector.shape_cast %82 : vector<1x8x8xf32> to vector<8x8xf32>
      %84 = vector.shape_cast %81 : vector<8x8xf32> to vector<1x8x8xf32>
      tpu.vector_store %arg11[%c1_59, %c0_60, %c0_61], %84 {strides = array<i32>} : memref<4x8x8xf32, #tpu.memory_space<vmem>>, vector<1x8x8xf32>,
      %85 = vector.extract_strided_slice %68 {offsets = [0, 16], sizes = [8, 8], strides = [1, 1]} : vector<8x64xf32> to vector<8x8xf32>
      %c2_62 = arith.constant 2 : index
      %c0_63 = arith.constant 0 : index
      %c0_64 = arith.constant 0 : index
      %86 = vector.load %arg10[%c2_62, %c0_63, %c0_64] : memref<4x8x8xf32, #tpu.memory_space<vmem>>, vector<1x8x8xf32>
      %87 = vector.shape_cast %86 : vector<1x8x8xf32> to vector<8x8xf32>
      %88 = vector.shape_cast %85 : vector<8x8xf32> to vector<1x8x8xf32>
      tpu.vector_store %arg10[%c2_62, %c0_63, %c0_64], %88 {strides = array<i32>} : memref<4x8x8xf32, #tpu.memory_space<vmem>>, vector<1x8x8xf32>,
      %89 = vector.extract_strided_slice %68 {offsets = [0, 48], sizes = [8, 8], strides = [1, 1]} : vector<8x64xf32> to vector<8x8xf32>
      %c2_65 = arith.constant 2 : index
      %c0_66 = arith.constant 0 : index
      %c0_67 = arith.constant 0 : index
      %90 = vector.load %arg11[%c2_65, %c0_66, %c0_67] : memref<4x8x8xf32, #tpu.memory_space<vmem>>, vector<1x8x8xf32>
      %91 = vector.shape_cast %90 : vector<1x8x8xf32> to vector<8x8xf32>
      %92 = vector.shape_cast %89 : vector<8x8xf32> to vector<1x8x8xf32>
      tpu.vector_store %arg11[%c2_65, %c0_66, %c0_67], %92 {strides = array<i32>} : memref<4x8x8xf32, #tpu.memory_space<vmem>>, vector<1x8x8xf32>,
      %93 = vector.extract_strided_slice %68 {offsets = [0, 24], sizes = [8, 8], strides = [1, 1]} : vector<8x64xf32> to vector<8x8xf32>
      %c3_68 = arith.constant 3 : index
      %c0_69 = arith.constant 0 : index
      %c0_70 = arith.constant 0 : index
      %94 = vector.load %arg10[%c3_68, %c0_69, %c0_70] : memref<4x8x8xf32, #tpu.memory_space<vmem>>, vector<1x8x8xf32>
      %95 = vector.shape_cast %94 : vector<1x8x8xf32> to vector<8x8xf32>
      %96 = vector.shape_cast %93 : vector<8x8xf32> to vector<1x8x8xf32>
      tpu.vector_store %arg10[%c3_68, %c0_69, %c0_70], %96 {strides = array<i32>} : memref<4x8x8xf32, #tpu.memory_space<vmem>>, vector<1x8x8xf32>,
      %97 = vector.extract_strided_slice %68 {offsets = [0, 56], sizes = [8, 8], strides = [1, 1]} : vector<8x64xf32> to vector<8x8xf32>
      %c3_71 = arith.constant 3 : index
      %c0_72 = arith.constant 0 : index
      %c0_73 = arith.constant 0 : index
      %98 = vector.load %arg11[%c3_71, %c0_72, %c0_73] : memref<4x8x8xf32, #tpu.memory_space<vmem>>, vector<1x8x8xf32>
      %99 = vector.shape_cast %98 : vector<1x8x8xf32> to vector<8x8xf32>
      %100 = vector.shape_cast %97 : vector<8x8xf32> to vector<1x8x8xf32>
      tpu.vector_store %arg11[%c3_71, %c0_72, %c0_73], %100 {strides = array<i32>} : memref<4x8x8xf32, #tpu.memory_space<vmem>>, vector<1x8x8xf32>,
    } else {
    }
    %c0 = arith.constant 0 : index
    %c0_1 = arith.constant 0 : index
    %c0_2 = arith.constant 0 : index
    %3 = vector.load %arg2[%c0, %c0_1, %c0_2] : memref<1x8x32xf32, #tpu.memory_space<vmem>>, vector<1x8x32xf32>
    %4 = vector.shape_cast %3 : vector<1x8x32xf32> to vector<8x32xf32>
    %c0_3 = arith.constant 0 : index
    %c0_4 = arith.constant 0 : index
    %5 = vector.load %arg4[%c0_3, %c0_4] : memref<32x32xf32, #tpu.memory_space<vmem>>, vector<32x32xf32>
    %cst = arith.constant dense<0.000000e+00> : vector<8x32xf32>
    %6 = tpu.matmul %4, %5, %cst {dimension_numbers = #tpu.dot_dimension_numbers<[1], [0], [0], [1], [0, 0, 1, 1], [], []>} : vector<8x32xf32>, vector<32x32xf32>, vector<8x32xf32> -> vector<8x32xf32>
    %7 = vector.extract_strided_slice %6 {offsets = [0, 0], sizes = [8, 8], strides = [1, 1]} : vector<8x32xf32> to vector<8x8xf32>
    %c0_5 = arith.constant 0 : index
    %c0_6 = arith.constant 0 : index
    %c0_7 = arith.constant 0 : index
    %8 = vector.load %arg9[%c0_5, %c0_6, %c0_7] : memref<4x8x8xf32, #tpu.memory_space<vmem>>, vector<1x8x8xf32>
    %9 = vector.shape_cast %8 : vector<1x8x8xf32> to vector<8x8xf32>
    %10 = vector.shape_cast %7 : vector<8x8xf32> to vector<1x8x8xf32>
    tpu.vector_store %arg9[%c0_5, %c0_6, %c0_7], %10 {strides = array<i32>} : memref<4x8x8xf32, #tpu.memory_space<vmem>>, vector<1x8x8xf32>,
    %11 = vector.extract_strided_slice %6 {offsets = [0, 8], sizes = [8, 8], strides = [1, 1]} : vector<8x32xf32> to vector<8x8xf32>
    %c1 = arith.constant 1 : index
    %c0_8 = arith.constant 0 : index
    %c0_9 = arith.constant 0 : index
    %12 = vector.load %arg9[%c1, %c0_8, %c0_9] : memref<4x8x8xf32, #tpu.memory_space<vmem>>, vector<1x8x8xf32>
    %13 = vector.shape_cast %12 : vector<1x8x8xf32> to vector<8x8xf32>
    %14 = vector.shape_cast %11 : vector<8x8xf32> to vector<1x8x8xf32>
    tpu.vector_store %arg9[%c1, %c0_8, %c0_9], %14 {strides = array<i32>} : memref<4x8x8xf32, #tpu.memory_space<vmem>>, vector<1x8x8xf32>,
    %15 = vector.extract_strided_slice %6 {offsets = [0, 16], sizes = [8, 8], strides = [1, 1]} : vector<8x32xf32> to vector<8x8xf32>
    %c2 = arith.constant 2 : index
    %c0_10 = arith.constant 0 : index
    %c0_11 = arith.constant 0 : index
    %16 = vector.load %arg9[%c2, %c0_10, %c0_11] : memref<4x8x8xf32, #tpu.memory_space<vmem>>, vector<1x8x8xf32>
    %17 = vector.shape_cast %16 : vector<1x8x8xf32> to vector<8x8xf32>
    %18 = vector.shape_cast %15 : vector<8x8xf32> to vector<1x8x8xf32>
    tpu.vector_store %arg9[%c2, %c0_10, %c0_11], %18 {strides = array<i32>} : memref<4x8x8xf32, #tpu.memory_space<vmem>>, vector<1x8x8xf32>,
    %19 = vector.extract_strided_slice %6 {offsets = [0, 24], sizes = [8, 8], strides = [1, 1]} : vector<8x32xf32> to vector<8x8xf32>
    %c3 = arith.constant 3 : index
    %c0_12 = arith.constant 0 : index
    %c0_13 = arith.constant 0 : index
    %20 = vector.load %arg9[%c3, %c0_12, %c0_13] : memref<4x8x8xf32, #tpu.memory_space<vmem>>, vector<1x8x8xf32>
    %21 = vector.shape_cast %20 : vector<1x8x8xf32> to vector<8x8xf32>
    %22 = vector.shape_cast %19 : vector<8x8xf32> to vector<1x8x8xf32>
    tpu.vector_store %arg9[%c3, %c0_12, %c0_13], %22 {strides = array<i32>} : memref<4x8x8xf32, #tpu.memory_space<vmem>>, vector<1x8x8xf32>,
    %c0_14 = arith.constant 0 : index
    %c0_15 = arith.constant 0 : index
    %c0_16 = arith.constant 0 : index
    %23 = vector.load %arg9[%c0_14, %c0_15, %c0_16] : memref<4x8x8xf32, #tpu.memory_space<vmem>>, vector<4x8x8xf32>
    %c0_17 = arith.constant 0 : index
    %c0_18 = arith.constant 0 : index
    %c0_19 = arith.constant 0 : index
    %24 = vector.load %arg10[%c0_17, %c0_18, %c0_19] : memref<4x8x8xf32, #tpu.memory_space<vmem>>, vector<4x8x8xf32>
    %c0_20 = arith.constant 0 : index
    %c0_21 = arith.constant 0 : index
    %c0_22 = arith.constant 0 : index
    %25 = vector.load %arg11[%c0_20, %c0_21, %c0_22] : memref<4x8x8xf32, #tpu.memory_space<vmem>>, vector<4x8x8xf32>
    "tpu.trace_start"() <{level = 10 : i32, message = "hqd,hkd->hqk"}> : () -> ()
    %cst_23 = arith.constant dense<0.000000e+00> : vector<4x8x8xf32>
    %26 = tpu.matmul %23, %24, %cst_23 {dimension_numbers = #tpu.dot_dimension_numbers<[2], [2], [1], [1], [0, 0, 0, 1, 1, 1], [0], [0]>} : vector<4x8x8xf32>, vector<4x8x8xf32>, vector<4x8x8xf32> -> vector<4x8x8xf32>
    "tpu.trace_stop"() : () -> ()
    %cst_24 = arith.constant 0.353553385 : f32
    %27 = vector.broadcast %cst_24 : f32 to vector<4x8x8xf32>
    %28 = arith.mulf %26, %27 : vector<4x8x8xf32>
    %cst_25 = arith.constant dense<0xFF800000> : vector<4x8xf32>
    %29 = vector.multi_reduction <maximumf>, %28, %cst_25 [2] : vector<4x8x8xf32> to vector<4x8xf32>
    %30 = vector.shape_cast %29 : vector<4x8xf32> to vector<4x8x1xf32>
    %31 = vector.broadcast %30 : vector<4x8x1xf32> to vector<4x8x8xf32>
    %32 = arith.subf %28, %31 : vector<4x8x8xf32>
    %33 = math.exp %32 : vector<4x8x8xf32>
    %cst_26 = arith.constant dense<0.000000e+00> : vector<4x8xf32>
    %34 = vector.multi_reduction <add>, %33, %cst_26 [2] : vector<4x8x8xf32> to vector<4x8xf32>
    %35 = vector.shape_cast %34 : vector<4x8xf32> to vector<4x8x1xf32>
    %36 = tpu.reciprocal %35 {approx = true} : vector<4x8x1xf32> -> vector<4x8x1xf32>
    %37 = arith.mulf %35, %36 : vector<4x8x1xf32>
    %cst_27 = arith.constant 2.000000e+00 : f32
    %38 = vector.broadcast %cst_27 : f32 to vector<4x8x1xf32>
    %39 = arith.subf %38, %37 : vector<4x8x1xf32>
    %40 = arith.mulf %36, %39 : vector<4x8x1xf32>
    %41 = vector.broadcast %40 : vector<4x8x1xf32> to vector<4x8x8xf32>
    %42 = arith.mulf %33, %41 : vector<4x8x8xf32>
    "tpu.trace_start"() <{level = 10 : i32, message = "hqk,hkd->hqd"}> : () -> ()
    %cst_28 = arith.constant dense<0.000000e+00> : vector<4x8x8xf32>
    %43 = tpu.matmul %42, %25, %cst_28 {dimension_numbers = #tpu.dot_dimension_numbers<[2], [1], [1], [2], [0, 0, 0, 1, 1, 2], [0], [0]>} : vector<4x8x8xf32>, vector<4x8x8xf32>, vector<4x8x8xf32> -> vector<4x8x8xf32>
    "tpu.trace_stop"() : () -> ()
    %44 = vector.extract_strided_slice %43 {offsets = [0, 0, 0], sizes = [1, 8, 8], strides = [1, 1, 1]} : vector<4x8x8xf32> to vector<1x8x8xf32>
    %45 = vector.shape_cast %44 : vector<1x8x8xf32> to vector<8x8xf32>
    %c0_29 = arith.constant 0 : index
    %c0_30 = arith.constant 0 : index
    %46 = vector.load %arg12[%c0_29, %c0_30] : memref<8x32xf32, #tpu.memory_space<vmem>>, vector<8x8xf32>
    tpu.vector_store %arg12[%c0_29, %c0_30], %45 {strides = array<i32>} : memref<8x32xf32, #tpu.memory_space<vmem>>, vector<8x8xf32>,
    %47 = vector.extract_strided_slice %43 {offsets = [1, 0, 0], sizes = [1, 8, 8], strides = [1, 1, 1]} : vector<4x8x8xf32> to vector<1x8x8xf32>
    %48 = vector.shape_cast %47 : vector<1x8x8xf32> to vector<8x8xf32>
    %c0_31 = arith.constant 0 : index
    %c8 = arith.constant 8 : index
    %49 = vector.load %arg12[%c0_31, %c8] : memref<8x32xf32, #tpu.memory_space<vmem>>, vector<8x8xf32>
    tpu.vector_store %arg12[%c0_31, %c8], %48 {strides = array<i32>} : memref<8x32xf32, #tpu.memory_space<vmem>>, vector<8x8xf32>,
    %50 = vector.extract_strided_slice %43 {offsets = [2, 0, 0], sizes = [1, 8, 8], strides = [1, 1, 1]} : vector<4x8x8xf32> to vector<1x8x8xf32>
    %51 = vector.shape_cast %50 : vector<1x8x8xf32> to vector<8x8xf32>
    %c0_32 = arith.constant 0 : index
    %c16 = arith.constant 16 : index
    %52 = vector.load %arg12[%c0_32, %c16] : memref<8x32xf32, #tpu.memory_space<vmem>>, vector<8x8xf32>
    tpu.vector_store %arg12[%c0_32, %c16], %51 {strides = array<i32>} : memref<8x32xf32, #tpu.memory_space<vmem>>, vector<8x8xf32>,
    %53 = vector.extract_strided_slice %43 {offsets = [3, 0, 0], sizes = [1, 8, 8], strides = [1, 1, 1]} : vector<4x8x8xf32> to vector<1x8x8xf32>
    %54 = vector.shape_cast %53 : vector<1x8x8xf32> to vector<8x8xf32>
    %c0_33 = arith.constant 0 : index
    %c24 = arith.constant 24 : index
    %55 = vector.load %arg12[%c0_33, %c24] : memref<8x32xf32, #tpu.memory_space<vmem>>, vector<8x8xf32>
    tpu.vector_store %arg12[%c0_33, %c24], %54 {strides = array<i32>} : memref<8x32xf32, #tpu.memory_space<vmem>>, vector<8x8xf32>,
    %c0_34 = arith.constant 0 : index
    %c0_35 = arith.constant 0 : index
    %56 = vector.load %arg12[%c0_34, %c0_35] : memref<8x32xf32, #tpu.memory_space<vmem>>, vector<8x32xf32>
    %c0_36 = arith.constant 0 : index
    %c0_37 = arith.constant 0 : index
    %57 = vector.load %arg6[%c0_36, %c0_37] : memref<32x32xf32, #tpu.memory_space<vmem>>, vector<32x32xf32>
    %cst_38 = arith.constant dense<0.000000e+00> : vector<8x32xf32>
    %58 = tpu.matmul %56, %57, %cst_38 {dimension_numbers = #tpu.dot_dimension_numbers<[1], [0], [0], [1], [0, 0, 1, 1], [], []>} : vector<8x32xf32>, vector<32x32xf32>, vector<8x32xf32> -> vector<8x32xf32>
    %c0_39 = arith.constant 0 : index
    %c0_40 = arith.constant 0 : index
    %59 = vector.load %arg7[%c0_39, %c0_40] : memref<1x32xf32, #tpu.memory_space<vmem>>, vector<1x32xf32>
    %60 = vector.broadcast %59 : vector<1x32xf32> to vector<8x32xf32>
    %61 = arith.addf %58, %60 : vector<8x32xf32>
    %c0_41 = arith.constant 0 : index
    %c0_42 = arith.constant 0 : index
    %c0_43 = arith.constant 0 : index
    %62 = vector.load %arg8[%c0_41, %c0_42, %c0_43] : memref<1x8x32xf32, #tpu.memory_space<vmem>>, vector<1x8x32xf32>
    %63 = vector.shape_cast %62 : vector<1x8x32xf32> to vector<8x32xf32>
    %64 = vector.shape_cast %61 : vector<8x32xf32> to vector<1x8x32xf32>
    tpu.vector_store %arg8[%c0_41, %c0_42, %c0_43], %64 {strides = array<i32>} : memref<1x8x32xf32, #tpu.memory_space<vmem>>, vector<1x8x32xf32>,
    return
  }
  func.func @transform_0(%arg0: i32, %arg1: i32) -> (i32, i32, i32) {
    %c0_i32 = arith.constant 0 : i32
    %c0_i32_0 = arith.constant 0 : i32
    return %arg0, %arg1, %c0_i32 : i32, i32, i32
  }
  func.func @transform_1(%arg0: i32, %arg1: i32) -> (i32, i32, i32) {
    %c0_i32 = arith.constant 0 : i32
    %c0_i32_0 = arith.constant 0 : i32
    %c0_i32_1 = arith.constant 0 : i32
    return %arg0, %c0_i32, %c0_i32_0 : i32, i32, i32
  }
  func.func @transform_2(%arg0: i32, %arg1: i32) -> (i32, i32) {
    %c0_i32 = arith.constant 0 : i32
    %c0_i32_0 = arith.constant 0 : i32
    %c0_i32_1 = arith.constant 0 : i32
    return %c0_i32, %c0_i32_0 : i32, i32
  }
  func.func @transform_3(%arg0: i32, %arg1: i32) -> (i32, i32) {
    %c0_i32 = arith.constant 0 : i32
    %c0_i32_0 = arith.constant 0 : i32
    %c0_i32_1 = arith.constant 0 : i32
    return %c0_i32, %c0_i32_0 : i32, i32
  }
  func.func @transform_4(%arg0: i32, %arg1: i32) -> (i32, i32) {
    %c0_i32 = arith.constant 0 : i32
    %c0_i32_0 = arith.constant 0 : i32
    %c0_i32_1 = arith.constant 0 : i32
    return %c0_i32, %c0_i32_0 : i32, i32
  }
  func.func @transform_5(%arg0: i32, %arg1: i32) -> (i32, i32) {
    %c0_i32 = arith.constant 0 : i32
    %c0_i32_0 = arith.constant 0 : i32
    %c0_i32_1 = arith.constant 0 : i32
    return %c0_i32, %c0_i32_0 : i32, i32
  }
  func.func @transform_6(%arg0: i32, %arg1: i32) -> (i32, i32, i32) {
    %c0_i32 = arith.constant 0 : i32
    %c0_i32_0 = arith.constant 0 : i32
    return %arg0, %arg1, %c0_i32 : i32, i32, i32
  }
}

</mosaic_0001>

<bundles_post_ra>
// kernel: tpu_custom_call.1
= control target key start
LH: loop header
LB: loop body
LE: loop exit
PB: predicated region body
PF: predicated region fallthrough
CT: control target
= control target key end

     0   :  { %s2496_s0 = inlined_call_operand.hbm [shape: f32[2,8,32], index: 0, kind: input, shape index: {}]   ;;  %s2497_s1 = inlined_call_operand.hbm [shape: f32[2,8,32], index: 1, kind: input, shape index: {}]   ;;  %s2498_s2 = inlined_call_operand.hbm [shape: f32[32,32], index: 2, kind: input, shape index: {}]   ;;  %s2499_s3 = inlined_call_operand.hbm [shape: f32[32,64], index: 3, kind: input, shape index: {}]   ;;  %s2500_s4 = inlined_call_operand.hbm [shape: f32[32,32], index: 4, kind: input, shape index: {}]   ;;  %s2501_s5 = inlined_call_operand.vmem [shape: f32[1,32], index: 5, kind: input, shape index: {}]   ;;  %s2502_s6 = inlined_call_operand.hbm [shape: f32[2,8,32], index: 6, kind: output, shape index: {}]  }
   0x1   :  { %2509 = sst [smem:[#allocation23_spill]] %s2498_s2 }
   0x2   :  { %2510 = sst [smem:[#allocation24_spill]] %s2499_s3 }
   0x3   :  { %2511 = sst [smem:[#allocation25_spill]] %s2500_s4 }
   0x4   :  { %11 = vsyncpa [#allocation7], 0 }
   0x5   :  { %13 = vsyncpa [#allocation7 + $0x1], 0 }
   0x6   :  { %14 = vsyncpa [#allocation10], 0 }
   0x7   :  { %16 = vsyncpa [#allocation10 + $0x1], 0 }
   0x8   :  { %17 = vsyncpa [#allocation13], 0 }
   0x9   :  { %18 = vsyncpa [#allocation8], 0 }
   0xa   :  { %20 = vsyncpa [#allocation8 + $0x1], 0  ;;  %s2085_s21 = smov 0   ;;  %s2087_s22 = smov 0  }
   0xb   :  { %s2089_s23 = smov 0   ;;  %s2091_s24 = smov 0  }
   0xc   :  { %s2093_s25 = smov 0   ;;  %s2095_s26 = smov 0  }
   0xd LB: > { %2512 = sst [smem:[#allocation21_spill]] %s2007_s21  ;;  %s2116_s27 = sadd.s32 4294967295, %s2027_s26   ;;  %s2027_s26 = sphi %s2095_s26, %s26_s26   ;;  %s2023_s25 = sphi %s2093_s25, %s2540_s25   ;;  %s2019_s24 = sphi %s2091_s24, %s2539_s24   ;;  %s2015_s23 = sphi %s2089_s23, %s2538_s23   ;;  %s2011_s22 = sphi %s2087_s22, %s2537_s22   ;;  %s2007_s21 = sphi %s2085_s21, %s2536_s21  }
   0xe   : > { %s1501_s28 = sadd.s32 4294967294, %s2027_s26   ;;  %p60_p0 = scmp.ne.s32.totalorder %s2011_s22, %s2007_s21 }
   0xf   : > { %p2503_p1 = scmp.eq.s32.totalorder %s2116_s27, 0  ;;  %p202_p3 = scmp.eq.s32.totalorder %s1501_s28, 1 }
  0x10   : > { %p1502_p5 = scmp.ge.s32.totalorder %s2027_s26, 1  ;;  %p209_p7 = scmp.lt.s32.totalorder %s2027_s26, 3 }
  0x11   : > { %p2125_p4 = por %p2503_p1, %p60_p0  ;;  %p2130_p6 = por %p202_p3, %p60_p0 }
  0x12   : > { %p2135_p8 = pnand %p1502_p5, %p209_p7  ;;  %s2029_s8 = smov [#allocation11]  }
  0x13   : > { %s2513_s29 = scalar_select %p2125_p4, 1, 0 }
  0x14   : > { %s2514_s30 = scalar_select %p2130_p6, 1, 0 }
  0x15   : > { %s2516_s7 = scalar_select %p2135_p8, 1, 0 }
  0x16   : > { %2515 = sst [smem:[#allocation22_spill]] %s2514_s30  ;;  %s221_s9 = sshll.u32 %s2029_s8, 4  ;;  %s2139_s9 = int_to_ptr.vmem [resolvable:$true] %s221_s9 }
  0x17   : > { %p1678_p9 = pneg %p2135_p8  ;;  %s2030_s11 = smov [#allocation12]  }
  0x18   : > { %s234_s12 = sshll.u32 %s2030_s11, 4  ;;  %s2031_s13 = smov [#allocation14]   ;;  %s2150_s12 = int_to_ptr.vmem [resolvable:$true] %s234_s12 }
  0x19   : > { %p2146_p11 = pnand %p1678_p9, %p2503_p1  ;;  %s2152_s14 = sshll.u32 %s2031_s13, 4  ;;  %s248_s14 = int_to_ptr.vmem [resolvable:$true] %s2152_s14 }
  0x1a   : > { %s2518_s2 = sld [smem:[#allocation23_spill]] }
  0x1b   : > { %p2162_p13 = pneg %p2146_p11 }
  0x20   : > { %s1789_s17 = scalar_lea.hbm %s2518_s2, 512 }
  0x21   : > { %p1790_p12 = scmp.ne.s32.totalorder %s2518_s2, %s1789_s17  ;;  %p1796_p5 = scmp.lt.u32.totalorder %s1789_s17, %s2518_s2 }
  0x23   : > { %p1792_p0 = pnand %p2162_p13, %p1790_p12 }
  0x25   : > { %p1793_p3 = pneg %p1792_p0 }
  0x27   : > { %p1798_p7 = pnand %p1796_p5, %p1793_p3 }
  0x29   : > { %1801 = shalt.err (!%p1798_p7)
}
  0x2a   : > { %s1802_s11 = scalar_lea.vmem %s2139_s9, 512  ;;  %p1810_p2 = scmp.lt.s32.totalorder %s2139_s9, %s2139_s9 }
  0x2b   : > { %p1803_p9 = scmp.ne.s32.totalorder %s2139_s9, %s1802_s11  ;;  %p1811_p6 = scmp.lt.s32.totalorder %s1802_s11, %s1802_s11 }
  0x2d   : > { %p1805_p10 = pnand %p1803_p9, %p2162_p13  ;;  %p1812_p12 = por %p1811_p6, %p1810_p2 }
  0x2f   : > { %p1806_p1 = pneg %p1805_p10 }
  0x31   : > { %p1813_p0 = pnand %p1812_p12, %p1806_p1 }
  0x33   : > { %1816 = shalt.err (!%p1813_p0)
}
  0x34   : > { %s2032_s13 = smov 128   ;;  %s2033_s15 = smov 8  }
  0x35   : > { %1681 = dma.hbm_to_vmem [thread:$0]  (!%p2146_p11), %s2518_s2, 512, %s2139_s9, [#allocation10], %s2032_s13, %s2032_s13, %s2033_s15  }
  0x36   : > { %s2520_s3 = sld [smem:[#allocation24_spill]] }
  0x3c   : > { %s1817_s28 = scalar_lea.hbm %s2520_s3, 512 }
  0x3d   : > { %p1818_p1 = scmp.ne.s32.totalorder %s2520_s3, %s1817_s28  ;;  %p1824_p10 = scmp.lt.u32.totalorder %s1817_s28, %s2520_s3 }
  0x3f   : > { %p1820_p2 = pnand %p1818_p1, %p2162_p13 }
  0x41   : > { %p1821_p6 = pneg %p1820_p2 }
  0x43   : > { %p1826_p3 = pnand %p1824_p10, %p1821_p6 }
  0x45   : > { %1829 = shalt.err (!%p1826_p3)
}
  0x46   : > { %s1830_s9 = scalar_lea.vmem %s2150_s12, 512  ;;  %p1838_p12 = scmp.lt.s32.totalorder %s2150_s12, %s2150_s12 }
  0x47   : > { %p1831_p5 = scmp.ne.s32.totalorder %s2150_s12, %s1830_s9  ;;  %p1839_p0 = scmp.lt.s32.totalorder %s1830_s9, %s1830_s9 }
  0x49   : > { %p1833_p7 = pnand %p1831_p5, %p2162_p13  ;;  %p1840_p1 = por %p1839_p0, %p1838_p12 }
  0x4b   : > { %p1834_p9 = pneg %p1833_p7 }
  0x4d   : > { %p1841_p2 = pnand %p1840_p1, %p1834_p9 }
  0x4f   : > { %1844 = shalt.err (!%p1841_p2)
}
  0x50   : > { %1684 = dma.hbm_to_vmem [thread:$0]  (!%p2146_p11), %s2520_s3, 512, %s2150_s12, [#allocation13], %s2032_s13, %s2032_s13, %s2033_s15  }
  0x51   : > { %s2521_s4 = sld [smem:[#allocation25_spill]] }
  0x57   : > { %s1845_s18 = scalar_lea.hbm %s2521_s4, 512 }
  0x58   : > { %p1846_p6 = scmp.ne.s32.totalorder %s2521_s4, %s1845_s18  ;;  %p1852_p5 = scmp.lt.u32.totalorder %s1845_s18, %s2521_s4 }
  0x5a   : > { %p1848_p10 = pnand %p1846_p6, %p2162_p13 }
  0x5c   : > { %p1849_p3 = pneg %p1848_p10 }
  0x5e   : > { %p1854_p7 = pnand %p1852_p5, %p1849_p3 }
  0x60   : > { %1857 = shalt.err (!%p1854_p7)
}
  0x61   : > { %s1858_s9 = scalar_lea.vmem %s248_s14, 512  ;;  %p1866_p1 = scmp.lt.s32.totalorder %s248_s14, %s248_s14 }
  0x62   : > { %p1859_p9 = scmp.ne.s32.totalorder %s248_s14, %s1858_s9  ;;  %p1867_p2 = scmp.lt.s32.totalorder %s1858_s9, %s1858_s9 }
  0x64   : > { %p1861_p12 = pnand %p1859_p9, %p2162_p13  ;;  %p1868_p4 = por %p1867_p2, %p1866_p1 }
  0x66   : > { %p1862_p0 = pneg %p1861_p12 }
  0x68   : > { %p1869_p8 = pnand %p1868_p4, %p1862_p0 }
  0x6a   : > { %1872 = shalt.err (!%p1869_p8)
}
  0x6b   : > { %1687 = dma.hbm_to_vmem [thread:$0]  (!%p2146_p11), %s2521_s4, 512, %s248_s14, [#allocation13], %s2032_s13, %s2032_s13, %s2033_s15  }
  0x6c   : > { %s47_s20 = sadd.s32 1, %s2015_s23  ;;  %s38_s10 = sadd.s32 1, %s2023_s25 }
  0x6d   : > { %p54_p4 = scmp.ne.s32.totalorder %s2015_s23, %s2011_s22  ;;  %p40_p8 = scmp.ge.s32.totalorder %s38_s10, 2 }
  0x6e   : > { %p55_p13 = scmp.eq.s32.totalorder %s2027_s26, 0  ;;  %p2522_p6 = scmp.eq.s32.totalorder %s2116_s27, 1 }
  0x6f   : > { %p1702_p3 = scmp.lt.s32.totalorder %s2027_s26, 2  ;;  %s2542_s10 = smov (%p40_p8, %s38_s10), 0 }
  0x70   : > { %p2241_p10 = por %p2522_p6, %p54_p4  ;;  %p56_p5 = por %p55_p13, %p54_p4 }
  0x71   : > { %s264_s16 = sand.u32 1, %s2015_s23   ;;  %s42_s17 = ssub.s32 %s2023_s25, %s2542_s10 }
  0x72   : > { %s2523_s30 = scalar_select %p2241_p10, 1, 0 }
  0x73   : > { %p45_p11 = scmp.eq.s32.totalorder %s42_s17, 0  ;;  %s2251_s14 = sshll.u32 %s264_s16, 3 }
  0x74   : > { %s1508_s13 = sshll.u32 %s2023_s25, 7  ;;  %s268_s8 = scalar_lea.vmem [#allocation6], %s2251_s14 }
  0x75   : > { %s2255_s15 = scalar_select %p45_p11, %s2015_s23, %s47_s20  }
  0x76   : > { %s2260_s28 = scalar_lea.hbm %s2496_s0, %s1508_s13  ;;  %s276_s11 = sshll.u32 %s268_s8, 4  ;;  %s2263_s11 = int_to_ptr.vmem [resolvable:$true] %s276_s11 }
  0x77   : > { %p2267_p7 = pnand %p1702_p3, %p56_p5  ;;  %s2274_s20 = scalar_lea.hbm %s2497_s1, %s1508_s13 }
  0x78   : > { %s283_s17 = sand.u32 1, %s2027_s26   ;;  %s265_s18 = scalar_lea.sflag [#allocation7], %s264_s16 }
  0x79   : > { %s1873_s19 = scalar_lea.hbm %s2260_s28, 128  ;;  %p1875_p12 = pneg %p2267_p7 }
  0x7a   : > { %p1874_p9 = scmp.ne.s32.totalorder %s2260_s28, %s1873_s19  ;;  %s1878_s3 = scalar_lea.hbm %s2496_s0, 256 }
  0x7b   : > { %p1879_p2 = scmp.lt.u32.totalorder %s2260_s28, %s2496_s0  ;;  %p1880_p4 = scmp.lt.u32.totalorder %s1878_s3, %s1873_s19 }
  0x7c   : > { %p1876_p0 = pnand %p1875_p12, %p1874_p9  ;;  %p1882_p13 = scmp.lt.u32.totalorder %s1873_s19, %s2260_s28 }
  0x7d   : > { %p1881_p8 = por %p1880_p4, %p1879_p2 }
  0x7e   : > { %p1877_p1 = pneg %p1876_p0 }
  0x7f   : > { %p1883_p6 = por %p1882_p13, %p1881_p8 }
  0x81   : > { %p1884_p3 = pnand %p1883_p6, %p1877_p1 }
  0x83   : > { %1887 = shalt.err (!%p1884_p3)
}
  0x84   : > { %s1888_s16 = scalar_lea.vmem %s2263_s11, 128  ;;  %s2034_s2 = smov [#allocation6]  }
  0x85   : > { %p1889_p5 = scmp.ne.s32.totalorder %s2263_s11, %s1888_s16  ;;  %s1893_s13 = sshll.u32 %s2034_s2, 4  ;;  %s1894_s13 = int_to_ptr.vmem [resolvable:$false] %s1893_s13 }
  0x86   : > { %s1895_s4 = scalar_lea.vmem %s1894_s13, 256  ;;  %p1896_p0 = scmp.lt.s32.totalorder %s2263_s11, %s1894_s13 }
  0x87   : > { %p1891_p11 = pnand %p1889_p5, %p1875_p12  ;;  %p1897_p2 = scmp.lt.s32.totalorder %s1895_s4, %s1888_s16 }
  0x89   : > { %p1892_p9 = pneg %p1891_p11  ;;  %p1898_p4 = por %p1897_p2, %p1896_p0 }
  0x8b   : > { %p1899_p8 = pnand %p1898_p4, %p1892_p9 }
  0x8d   : > { %1902 = shalt.err (!%p1899_p8)
}
  0x8e   : > { %1691 = dma.hbm_to_vmem [thread:$0]  (!%p2267_p7), %s2260_s28, 128, %s2263_s11, %s265_s18  }
  0x8f   : > { %s287_s3 = scalar_lea.vmem [#allocation9], %s2251_s14  ;;  %s284_s19 = scalar_lea.sflag [#allocation10], %s283_s17 }
  0x90   : > { %s294_s21 = sshll.u32 %s287_s3, 4  ;;  %s1903_s8 = scalar_lea.hbm %s2274_s20, 128  ;;  %s295_s21 = int_to_ptr.vmem [resolvable:$true] %s294_s21 }
  0x91   : > { %p1904_p1 = scmp.ne.s32.totalorder %s2274_s20, %s1903_s8  ;;  %s1908_s2 = scalar_lea.hbm %s2497_s1, 256 }
  0x92   : > { %p1909_p3 = scmp.lt.u32.totalorder %s2274_s20, %s2497_s1  ;;  %p1910_p5 = scmp.lt.u32.totalorder %s1908_s2, %s1903_s8 }
  0x93   : > { %p1906_p13 = pnand %p1904_p1, %p1875_p12  ;;  %p1912_p9 = scmp.lt.u32.totalorder %s1903_s8, %s2274_s20 }
  0x94   : > { %p1911_p11 = por %p1910_p5, %p1909_p3 }
  0x95   : > { %p1907_p6 = pneg %p1906_p13 }
  0x96   : > { %p1913_p0 = por %p1912_p9, %p1911_p11 }
  0x98   : > { %p1914_p2 = pnand %p1913_p0, %p1907_p6 }
  0x9a   : > { %1917 = shalt.err (!%p1914_p2)
}
  0x9b   : > { %s1918_s14 = scalar_lea.vmem %s295_s21, 128  ;;  %s2035_s28 = smov [#allocation9]  }
  0x9c   : > { %p1919_p4 = scmp.ne.s32.totalorder %s295_s21, %s1918_s14  ;;  %s1923_s11 = sshll.u32 %s2035_s28, 4  ;;  %s1924_s11 = int_to_ptr.vmem [resolvable:$false] %s1923_s11 }
  0x9d   : > { %s1925_s17 = scalar_lea.vmem %s1924_s11, 256  ;;  %p1926_p13 = scmp.lt.s32.totalorder %s295_s21, %s1924_s11 }
  0x9e   : > { %p1921_p8 = pnand %p1919_p4, %p1875_p12  ;;  %p1927_p10 = scmp.lt.s32.totalorder %s1925_s17, %s1918_s14 }
  0xa0   : > { %p1922_p1 = pneg %p1921_p8  ;;  %p1928_p3 = por %p1927_p10, %p1926_p13 }
  0xa2   : > { %p1929_p5 = pnand %p1928_p3, %p1922_p1 }
  0xa4   : > { %1932 = shalt.err (!%p1929_p5)
}
  0xa5   : > { %1694 = dma.hbm_to_vmem [thread:$0]  (!%p2267_p7), %s2274_s20, 128, %s295_s21, %s284_s19  }
  0xa6   : > { %p2525_p6 = scmp.ne.s32.totalorder %s2516_s7, 0 }
  0xa7   : > { %s2327_s18 = sand.u32 (!%p2525_p6), 1, %s2011_s22   ;;  %p2526_p10 = scmp.ne.s32.totalorder (!%p2525_p6), %s2513_s29, 0 }
  0xa8   : > { %303 = sbr.rel (%p2525_p6) target bundleno = 1639 (0x667), region = 44  ;;  %s2330_s3 = sshll.u32 (!%p2525_p6), %s2327_s18, 3 }
  0xa9   : > { %s306_s8 = scalar_lea.sflag (!%p2525_p6), [#allocation7], %s2327_s18  ;;  %s309_s12 = scalar_lea.vmem (!%p2525_p6), [#allocation6], %s2330_s3 }
  0xaf   : > { %1986 = dma.done.wait (%p2526_p10), %s306_s8, 128  }
  0xb0   : > { %1988 = vsyncadd (%p2526_p10), %s306_s8, 4294967168  ;;  %s314_s7 = sand.u32 1, %s2116_s27   ;;  %s318_s20 = scalar_lea.vmem [#allocation9], %s2330_s3 }
  0xb1   : > { %s315_s9 = scalar_lea.sflag [#allocation10], %s314_s7 }
  0xb2   : > { %1990 = dma.done.wait (%p2526_p10), %s315_s9, 128  }
  0xb3   : > { %1992 = vsyncadd (%p2526_p10), %s315_s9, 4294967168  ;;  %p2527_p7 = scmp.eq.s32.totalorder %s2116_s27, 0 }
  0xb5   : > { %1994 = dma.done.wait (%p2527_p7), [#allocation10], 512   ;;  %p2528_p12 = pmov %p2527_p7 }
  0xb6   : > { %p2529_p11 = pmov %p2527_p7 }
  0xb7   : > { %1996 = vsyncadd (%p2528_p12), [#allocation10], 4294966784 }
  0xb8   : > { %1998 = dma.done.wait (%p2529_p11), [#allocation13], 1024   ;;  %p2530_p9 = pmov %p2527_p7 }
  0xb9   : > { %v2036_v0 = vmov 0.0|0.0   ;;  %vm2037_vm0 = vmmov 0   ;;  %v2038_v1 = vmov 0.0   ;;  %v369_v2 = vld [vmem:[#allocation12] sm:$0xff]  ;;  %v370_v3 = vld [vmem:[#allocation12 + $0x8] sm:$0xff]  ;;  %v371_v7 = vld [vmem:[#allocation12 + $0x10] sm:$0xff] }
  0xba   : > { %2000 = vsyncadd (%p2530_p9), [#allocation13], 4294966272  ;;  %1642 = vmatprep.subr.bf16.mxu0 %v2036_v0  ;;  %1648 = vmatprep.subr.bf16.mxu1 %v2036_v0  ;;  %v485_v4 = vld [vmem:[#allocation11] sm:$0xff]  ;;  %v1643_v5 = vpack.c.bf16 %v370_v3, %v369_v2  ;;  %v486_v6 = vld [vmem:[#allocation11 + $0x8] sm:$0xff]  ;;  %vm373_vm1 = vcmask 261120   ;;  %vm447_vm2 = vcmask 64512  }
  0xbb   : > { %1577 = vmatprep.mubr.msk.f32.mxu0 %vm2037_vm0, %v2038_v1  ;;  %1588 = vmatprep.mubr.msk.f32.mxu1 %vm2037_vm0, %v2038_v1  ;;  %v372_v8 = vld [vmem:[#allocation12 + $0x18] sm:$0xff]  ;;  %v1649_v9 = vpack.c.bf16 %v486_v6, %v485_v4  ;;  %v487_v10 = vld [vmem:[#allocation11 + $0x10] sm:$0xff]  ;;  %v484_v15 = vld [vmem:[%s309_s12] sm:$0xff]  ;;  %s2039_s27 = smov 120   ;;  %s2040_s29 = smov 112   ;;  %vm1254_vm3 = vcmask 130112  }
  0xbc   : > { %v488_v11 = vld [vmem:[#allocation11 + $0x18] sm:$0xff]  ;;  %1644 = vmatpush3.bf16.msra.mxu0 %v1643_v5  ;;  %v1646_v12 = vpack.c.bf16 %v372_v8, %v371_v7  ;;  %s2041_s21 = smov 104   ;;  %s2042_s19 = smov 96   ;;  %vm1260_vm4 = vcmask 195712   ;;  %vm1266_vm5 = vcmask 261312  }
  0xbd   : > { %1650 = vmatpush3.bf16.msra.mxu1 %v1649_v9  ;;  %1645 = vmatprep.subr.bf16.mxu0 %v2036_v0  ;;  %v1652_v13 = vpack.c.bf16 %v488_v11, %v487_v10  ;;  %v368_v14 = vld [vmem:[%s318_s20] sm:$0xff]  ;;  %s2043_s16 = smov 80   ;;  %s2044_s2 = smov 72  }
  0xbe   : > { %1651 = vmatprep.subr.bf16.mxu1 %v2036_v0  ;;  %s2045_s13 = smov 88   ;;  %s2046_s4 = smov 8  }
  0xbf   : > { %s2047_s14 = smov 16   ;;  %s2048_s28 = smov 24  }
  0xc0   : > { %1647 = vmatpush3.bf16.msra.mxu0 %v1646_v12  ;;  %s1535_s8 = sshll.u32 %s2019_s24, 7  ;;  %s363_s12 = scalar_lea.vmem [#allocation15], %s2330_s3 }
  0xc1   : > { %1653 = vmatpush3.bf16.msra.mxu1 %v1652_v13  ;;  %1601 = vmatprep.subr.mxu0 %v2038_v1  ;;  %s1369_s7 = sshll.u32 %s363_s12, 4  ;;  %p2531_p2 = scmp.ne.s32.totalorder %s2523_s30, 0  ;;  %s2448_s7 = int_to_ptr.vmem [resolvable:$true] %s1369_s7 }
  0xc2   : > { %1591 = vmatprep.subr.mxu1 %v2038_v1  ;;  %s2049_s24 = smov [#allocation15]  }
  0xc3   : > { %1578 = vmatmul.mubr.msk.f32.vlgmr.msra.gmra.mrb[0].mxu0 %vm373_vm1, %v368_v14  ;;  %s1937_s3 = sshll.u32 %s2049_s24, 4  ;;  %s1938_s3 = int_to_ptr.vmem [resolvable:$false] %s1937_s3 }
  0xc4   : > { %1589 = vmatmul.mubr.msk.f32.vlgmr.msra.gmra.mrb[0].mxu1 %vm373_vm1, %v484_v15  ;;  %1603 = vmatprep.mubr.msk.f32.mxu0 %vm2037_vm0, %v2038_v1  ;;  %p1940_p1 = scmp.lt.s32.totalorder %s2448_s7, %s1938_s3 }
  0xc5   : > { %1593 = vmatprep.mubr.msk.f32.mxu1 %vm2037_vm0, %v2038_v1 }
 0x196   : > { %v2372_v16 = vpop.f32.mrb[0].mxu0 }
 0x197   : > { %448 = vst.msk [vmem:[#allocation3] sm:$0xff] %vm447_vm2, %v2372_v16  ;;  %v559_v17 = vpop.f32.mrb[0].mxu1  ;;  %454 = vrot.lane.b32.xlu0 %v2372_v16, %s2039_s27  ;;  %v1579_v18 = vpop.f32.mrb[1].mxu0 }
 0x198   : > { %564 = vst.msk [vmem:[#allocation2] sm:$0xff] %vm447_vm2, %v559_v17  ;;  %566 = vrot.lane.b32.xlu1 %v559_v17, %s2039_s27  ;;  %v1590_v19 = vpop.f32.mrb[1].mxu1  ;;  %s2446_s27 = scalar_lea.hbm %s2502_s6, %s1535_s8 }
 0x19b   : > { %464 = vrot.lane.b32.xlu0 %v2372_v16, %s2040_s29 }
 0x19c   : > { %474 = vrot.lane.b32.xlu1 %v2372_v16, %s2041_s21 }
 0x19e   : > { %v585_v20 = vld [vmem:[#allocation3] sm:$0xff] }
 0x19f   : > { %571 = vrot.lane.b32.xlu0 %v559_v17, %s2040_s29  ;;  %1592 = vmatpush3.xpose.msk.msra.mxu1 %vm447_vm2, %v585_v20  ;;  %v581_v21 = vld [vmem:[#allocation2] sm:$0xff]  ;;  %s1355_s29 = scalar_lea.sflag [#allocation8], %s2327_s18 }
 0x1a0   : > { %576 = vrot.lane.b32.xlu1 %v559_v17, %s2041_s21  ;;  %1596 = vmatprep.subr.mxu1 %v2038_v1  ;;  %s1933_s21 = scalar_lea.vmem %s2448_s7, 128 }
 0x1a1   : > { %p1934_p0 = scmp.ne.s32.totalorder %s2448_s7, %s1933_s21 }
 0x1a2   : > { %1594 = vmatmul.mubr.msk.f32.vlgmr.msra.gmra.mrb[2].mxu1 %vm447_vm2, %v581_v21 }
 0x1a3   : > { %1598 = vmatprep.mubr.msk.f32.mxu1 %vm2037_vm0, %v2038_v1  ;;  %p1935_p4 = pnand %p1934_p0, %p2531_p2 }
 0x1a5   : > { %p1936_p8 = pneg %p1935_p4 }
 0x209   : > { %v455_v22 = vpop.permute.xlu0 %454 }
 0x20a   : > { %v567_v23 = vpop.permute.xlu1 %566  ;;  %458 = vst.msk [vmem:[#allocation3 + $0x8] sm:$0xff] %vm447_vm2, %v455_v22 }
 0x20b   : > { %570 = vst.msk [vmem:[#allocation2 + $0x8] sm:$0xff] %vm447_vm2, %v567_v23 }
 0x20d   : > { %v465_v24 = vpop.permute.xlu0 %464 }
 0x20e   : > { %v475_v25 = vpop.permute.xlu1 %474  ;;  %468 = vst.msk [vmem:[#allocation3 + $0x10] sm:$0xff] %vm447_vm2, %v465_v24 }
 0x20f   : > { %478 = vst.msk [vmem:[#allocation3 + $0x18] sm:$0xff] %vm447_vm2, %v475_v25 }
 0x211   : > { %v572_v26 = vpop.permute.xlu0 %571  ;;  %v586_v27 = vld [vmem:[#allocation3 + $0x8] sm:$0xff] }
 0x212   : > { %v577_v28 = vpop.permute.xlu1 %576  ;;  %575 = vst.msk [vmem:[#allocation2 + $0x10] sm:$0xff] %vm447_vm2, %v572_v26  ;;  %1597 = vmatpush3.xpose.msk.msra.mxu1 %vm447_vm2, %v586_v27  ;;  %v582_v29 = vld [vmem:[#allocation2 + $0x8] sm:$0xff] }
 0x213   : > { %580 = vst.msk [vmem:[#allocation2 + $0x18] sm:$0xff] %vm447_vm2, %v577_v28  ;;  %1606 = vmatprep.subr.mxu1 %v2038_v1 }
 0x215   : > { %1599 = vmatmul.mubr.msk.f32.vlgmr.msra.gmra.mrb[4].mxu1 %vm447_vm2, %v582_v29  ;;  %v587_v30 = vld [vmem:[#allocation3 + $0x10] sm:$0xff] }
 0x216   : > { %1602 = vmatpush3.xpose.msk.msra.mxu0 %vm447_vm2, %v587_v30  ;;  %v588_v31 = vld [vmem:[#allocation3 + $0x18] sm:$0xff]  ;;  %1608 = vmatprep.mubr.msk.f32.mxu1 %vm2037_vm0, %v2038_v1 }
 0x217   : > { %1607 = vmatpush3.xpose.msk.msra.mxu1 %vm447_vm2, %v588_v31  ;;  %1611 = vmatprep.subr.mxu0 %v2038_v1 }
 0x218   : > { %1616 = vmatprep.subr.mxu1 %v2038_v1 }
 0x219   : > { %v583_v32 = vld [vmem:[#allocation2 + $0x10] sm:$0xff] }
 0x21a   : > { %1604 = vmatmul.mubr.msk.f32.vlgmr.msra.gmra.mrb[2].mxu0 %vm447_vm2, %v583_v32  ;;  %v584_v33 = vld [vmem:[#allocation2 + $0x18] sm:$0xff] }
 0x21b   : > { %1609 = vmatmul.mubr.msk.f32.vlgmr.msra.gmra.mrb[6].mxu1 %vm447_vm2, %v584_v33  ;;  %1613 = vmatprep.mubr.msk.f32.mxu0 %vm2037_vm0, %v2038_v1 }
 0x21c   : > { %1618 = vmatprep.mubr.msk.f32.mxu1 %vm2037_vm0, %v2038_v1 }
 0x275   : > { %v665_v34 = vpop.f32.mrb[2].mxu1 }
 0x276   : > { %v897_v35 = vmul.f32 0.35355338, %v665_v34  ;;  %v1595_v36 = vpop.f32.mrb[3].mxu1 }
 0x278   : > { %v901_v37 = vsel %vm447_vm2, %v897_v35, -inf }
 0x279   : > { %902 = vmax.xlane.f32.xlu0 %v901_v37 }
 0x2e8   : > { %v741_v38 = vpop.f32.mrb[4].mxu1 }
 0x2e9   : > { %v898_v39 = vmul.f32 0.35355338, %v741_v38  ;;  %v1600_v40 = vpop.f32.mrb[5].mxu1 }
 0x2eb   : > { %v904_v41 = vsel %vm447_vm2, %v898_v39, -inf }
 0x2ec   : > { %905 = vmax.xlane.f32.xlu1 %v904_v41 }
 0x2ed   : > { %v817_v42 = vpop.f32.mrb[2].mxu0 }
 0x2ee   : > { %v899_v43 = vmul.f32 0.35355338, %v817_v42  ;;  %v893_v44 = vpop.f32.mrb[6].mxu1  ;;  %v1605_v45 = vpop.f32.mrb[3].mxu0  ;;  %v1269_v42 = vld [vmem:[#allocation14] sm:$0xff] }
 0x2ef   : > { %v1610_v46 = vpop.f32.mrb[7].mxu1  ;;  %v900_v47 = vmul.f32 0.35355338, %v893_v44  ;;  %v1271_v45 = vld [vmem:[#allocation14 + $0x10] sm:$0xff] }
 0x2f0   : > { %v907_v48 = vsel %vm447_vm2, %v899_v43, -inf  ;;  %v1272_v46 = vld [vmem:[#allocation14 + $0x18] sm:$0xff] }
 0x2f1   : > { %908 = vmax.xlane.f32.xlu0 %v907_v48  ;;  %v910_v49 = vsel %vm447_vm2, %v900_v47, -inf }
 0x2f5   : > { %911 = vmax.xlane.f32.xlu0 %v910_v49 }
 0x2fd   : > { %450 = vrot.lane.b32.xlu1 %v2372_v16, %s2042_s19  ;;  %s1939_s19 = scalar_lea.vmem %s1938_s3, 256 }
 0x2fe   : > { %p1941_p13 = scmp.lt.s32.totalorder %s1939_s19, %s1933_s21 }
 0x300   : > { %p1942_p3 = por %p1941_p13, %p1940_p1 }
 0x302   : > { %p1943_p5 = pnand %p1942_p3, %p1936_p8 }
 0x306   : > { %v903_v50 = vpop.xlane.xlu0 %902 }
 0x307   : > { %v913_v51 = vsub.f32 %v897_v35, %v903_v50 }
 0x309   : > { %v917_v52 = vmul.f32 1.442695, %v913_v51 }
 0x30b   : > { %1773 = vpow2.f32 %v917_v52 }
 0x315   : > { %v1774_v53 = vpop.eup %1773 }
 0x316   : > { %v925_v54 = vsel %vm447_vm2, %v1774_v53, 0.0 }
 0x321   : > { %926 = vadd.xlane.f32.xlu1 %v925_v54 }
 0x379   : > { %v906_v55 = vpop.xlane.xlu1 %905 }
 0x37a   : > { %v914_v56 = vsub.f32 %v898_v39, %v906_v55 }
 0x37c   : > { %v919_v57 = vmul.f32 1.442695, %v914_v56  ;;  %v1532_v56 = vld [vmem:[%s2501_s5] ss:$0 sm:$0xff] }
 0x37d   : > { %v451_v58 = vpop.permute.xlu1 %450 }
 0x37e   : > { %1775 = vpow2.f32 %v919_v57  ;;  %453 = vst.msk [vmem:[#allocation4] sm:$0xff] %vm447_vm2, %v451_v58  ;;  %v909_v59 = vpop.xlane.xlu0 %908 }
 0x37f   : > { %v915_v60 = vsub.f32 %v899_v43, %v909_v59  ;;  %v1270_v43 = vld [vmem:[#allocation14 + $0x8] sm:$0xff] }
 0x380   : > { %v1655_v44 = vpack.c.bf16 %v1270_v43, %v1269_v42 }
 0x381   : > { %v921_v61 = vmul.f32 1.442695, %v915_v60 }
 0x382   : > { %v912_v62 = vpop.xlane.xlu0 %911 }
 0x383   : > { %1777 = vpow2.f32 %v921_v61  ;;  %v916_v63 = vsub.f32 %v900_v47, %v912_v62  ;;  %v1658_v47 = vpack.c.bf16 %v1272_v46, %v1271_v45 }
 0x385   : > { %v923_v2 = vmul.f32 1.442695, %v916_v63  ;;  %v589_v3 = vld [vmem:[#allocation4] sm:$0xff] }
 0x386   : > { %1612 = vmatpush3.msra.mxu0 %v589_v3 }
 0x387   : > { %1779 = vpow2.f32 %v923_v2  ;;  %1621 = vmatprep.subr.mxu0 %v2038_v1 }
 0x388   : > { %v1776_v4 = vpop.eup %1775 }
 0x389   : > { %v928_v5 = vsel %vm447_vm2, %v1776_v4, 0.0 }
 0x38a   : > { %929 = vadd.xlane.f32.xlu0 %v928_v5 }
 0x38d   : > { %v1778_v6 = vpop.eup %1777 }
 0x38e   : > { %v931_v7 = vsel %vm447_vm2, %v1778_v6, 0.0 }
 0x38f   : > { %932 = vadd.xlane.f32.xlu1 %v931_v7 }
 0x391   : > { %v1780_v8 = vpop.eup %1779 }
 0x392   : > { %v934_v9 = vsel %vm447_vm2, %v1780_v8, 0.0 }
 0x393   : > { %935 = vadd.xlane.f32.xlu0 %v934_v9 }
 0x3a0   : > { %469 = vrot.lane.b32.xlu1 %v2372_v16, %s2043_s16 }
 0x3a4   : > { %479 = vrot.lane.b32.xlu1 %v2372_v16, %s2044_s2 }
 0x3a9   : > { %459 = vrot.lane.b32.xlu0 %v2372_v16, %s2045_s13 }
 0x3ae   : > { %v927_v10 = vpop.xlane.xlu1 %926 }
 0x3af   : > { %1781 = vrcp.f32 %v927_v10 }
 0x3b9   : > { %v1782_v11 = vpop.eup %1781 }
 0x3ba   : > { %v941_v12 = vmul.f32 %v1782_v11, %v927_v10 }
 0x3bc   : > { %v945_v13 = vsub.f32 2.0, %v941_v12 }
 0x3be   : > { %v949_v14 = vmul.f32 %v1782_v11, %v945_v13 }
 0x3c0   : > { %v953_v15 = vmul.f32 %v1774_v53, %v949_v14 }
 0x3c2   : > { %1614 = vmatmul.mubr.msk.f32.vlgmr.msra.gmra.mrb[4].mxu0 %vm447_vm2, %v953_v15 }
 0x3c3   : > { %1623 = vmatprep.mubr.msk.f32.mxu0 %vm2037_vm0, %v2038_v1 }
 0x417   : > { %v930_v17 = vpop.xlane.xlu0 %929 }
 0x418   : > { %1783 = vrcp.f32 %v930_v17 }
 0x41c   : > { %v933_v18 = vpop.xlane.xlu1 %932 }
 0x41d   : > { %1785 = vrcp.f32 %v933_v18 }
 0x420   : > { %v470_v19 = vpop.permute.xlu1 %469  ;;  %v936_v20 = vpop.xlane.xlu0 %935 }
 0x421   : > { %473 = vst.msk [vmem:[#allocation4 + $0x10] sm:$0xff] %vm447_vm2, %v470_v19  ;;  %1787 = vrcp.f32 %v936_v20 }
 0x422   : > { %v1784_v16 = vpop.eup %1783 }
 0x423   : > { %v942_v21 = vmul.f32 %v1784_v16, %v930_v17 }
 0x424   : > { %v480_v22 = vpop.permute.xlu1 %479  ;;  %v460_v23 = vpop.permute.xlu0 %459 }
 0x425   : > { %v946_v24 = vsub.f32 2.0, %v942_v21  ;;  %483 = vst.msk [vmem:[#allocation4 + $0x18] sm:$0xff] %vm447_vm2, %v480_v22  ;;  %463 = vst.msk [vmem:[#allocation4 + $0x8] sm:$0xff] %vm447_vm2, %v460_v23 }
 0x427   : > { %v1786_v25 = vpop.eup %1785  ;;  %v950_v26 = vmul.f32 %v1784_v16, %v946_v24 }
 0x428   : > { %v943_v27 = vmul.f32 %v1786_v25, %v933_v18  ;;  %v591_v28 = vld [vmem:[#allocation4 + $0x10] sm:$0xff] }
 0x429   : > { %1622 = vmatpush3.msra.mxu0 %v591_v28  ;;  %v954_v31 = vmul.f32 %v1776_v4, %v950_v26 }
 0x42a   : > { %v947_v29 = vsub.f32 2.0, %v943_v27  ;;  %1654 = vmatprep.subr.bf16.mxu0 %v2036_v0 }
 0x42b   : > { %v1788_v30 = vpop.eup %1787 }
 0x42c   : > { %v951_v32 = vmul.f32 %v1786_v25, %v947_v29  ;;  %v944_v33 = vmul.f32 %v1788_v30, %v936_v20  ;;  %v590_v34 = vld [vmem:[#allocation4 + $0x8] sm:$0xff]  ;;  %v592_v37 = vld [vmem:[#allocation4 + $0x18] sm:$0xff] }
 0x42d   : > { %1617 = vmatpush3.msra.mxu1 %v590_v34 }
 0x42e   : > { %v955_v35 = vmul.f32 %v1778_v6, %v951_v32  ;;  %v948_v36 = vsub.f32 2.0, %v944_v33  ;;  %1619 = vmatmul.mubr.msk.f32.vlgmr.msra.gmra.mrb[8].mxu1 %vm447_vm2, %v954_v31  ;;  %1626 = vmatprep.subr.mxu1 %v2038_v1 }
 0x42f   : > { %1627 = vmatpush3.msra.mxu1 %v592_v37  ;;  %1628 = vmatprep.mubr.msk.f32.mxu1 %vm2037_vm0, %v2038_v1 }
 0x430   : > { %v952_v38 = vmul.f32 %v1788_v30, %v948_v36  ;;  %1624 = vmatmul.mubr.msk.f32.vlgmr.msra.gmra.mrb[6].mxu0 %vm447_vm2, %v955_v35 }
 0x431   : > { %1639 = vmatprep.mubr.msk.f32.mxu0 %vm2037_vm0, %v2038_v1  ;;  %1656 = vmatpush3.bf16.msra.mxu0 %v1655_v44 }
 0x432   : > { %v956_v39 = vmul.f32 %v1780_v8, %v952_v38  ;;  %1657 = vmatprep.subr.bf16.mxu0 %v2036_v0 }
 0x434   : > { %1629 = vmatmul.mubr.msk.f32.vlgmr.msra.gmra.mrb[10].mxu1 %vm447_vm2, %v956_v39 }
 0x435   : > { %1659 = vmatpush3.bf16.msra.mxu0 %v1658_v47 }
 0x495   : > { %v1026_v40 = vpop.f32.mrb[4].mxu0 }
 0x496   : > { %1249 = vst.msk [vmem:[#allocation5] sm:$0xff] %vm447_vm2, %v1026_v40  ;;  %v1615_v41 = vpop.f32.mrb[5].mxu0 }
 0x501   : > { %v1099_v48 = vpop.f32.mrb[8].mxu1 }
 0x502   : > { %1251 = vrot.lane.b32.xlu0 %v1099_v48, %s2046_s4  ;;  %v1620_v1 = vpop.f32.mrb[9].mxu1 }
 0x503   : > { %v1172_v49 = vpop.f32.mrb[6].mxu0 }
 0x504   : > { %1257 = vrot.lane.b32.xlu1 %v1172_v49, %s2047_s14  ;;  %v1625_v50 = vpop.f32.mrb[7].mxu0 }
 0x507   : > { %v1245_v51 = vpop.f32.mrb[10].mxu1 }
 0x508   : > { %1263 = vrot.lane.b32.xlu0 %v1245_v51, %s2048_s28  ;;  %v1630_v52 = vpop.f32.mrb[11].mxu1 }
 0x574   : > { %v1252_v53 = vpop.permute.xlu0 %1251 }
 0x575   : > { %1255 = vst.msk [vmem:[#allocation5] sm:$0xff] %vm1254_vm3, %v1252_v53 }
 0x576   : > { %v1258_v0 = vpop.permute.xlu1 %1257 }
 0x577   : > { %1261 = vst.msk [vmem:[#allocation5] sm:$0xff] %vm1260_vm4, %v1258_v0 }
 0x57a   : > { %v1264_v54 = vpop.permute.xlu0 %1263 }
 0x57b   : > { %1267 = vst.msk [vmem:[#allocation5] sm:$0xff] %vm1266_vm5, %v1264_v54 }
 0x582   : > { %v1268_v55 = vld [vmem:[#allocation5] sm:$0xff] }
 0x583   : > { %1640 = vmatmul.mubr.msk.f32.vlgmr.msra.gmra.mrb[8].mxu0 %vm373_vm1, %v1268_v55 }
 0x656   : > { %v1349_v57 = vpop.f32.mrb[8].mxu0 }
 0x657   : > { %v1350_v58 = vadd.f32 %v1532_v56, %v1349_v57  ;;  %v1641_v59 = vpop.f32.mrb[9].mxu0 }
 0x659   : > { %1353 = vst.msk [vmem:[%s363_s12] sm:$0xff] %vm373_vm1, %v1350_v58 }
 0x65a   : > { %1946 = shalt.err (!%p1943_p5)
}
 0x65b   : > { %s1947_s18 = scalar_lea.hbm %s2446_s27, 128  ;;  %s1951_s13 = scalar_lea.hbm %s2502_s6, 256 }
 0x65c   : > { %p1948_p6 = scmp.ne.s32.totalorder %s2446_s27, %s1947_s18  ;;  %p1952_p12 = scmp.lt.u32.totalorder %s2446_s27, %s2502_s6 }
 0x65d   : > { %p1953_p11 = scmp.lt.u32.totalorder %s1951_s13, %s1947_s18  ;;  %p1955_p0 = scmp.lt.u32.totalorder %s1947_s18, %s2446_s27 }
 0x65e   : > { %p1949_p10 = pnand %p1948_p6, %p2531_p2 }
 0x65f   : > { %p1954_p9 = por %p1953_p11, %p1952_p12 }
 0x660   : > { %p1950_p7 = pneg %p1949_p10 }
 0x661   : > { %p1956_p4 = por %p1955_p0, %p1954_p9 }
 0x663   : > { %p1957_p8 = pnand %p1956_p4, %p1950_p7 }
 0x665   : > { %1960 = shalt.err (!%p1957_p8)
}
 0x666   : > { %1676 = dma.vmem_to_hbm [thread:$0]  (%p2531_p2), %s2448_s7, 128, %s2446_s27, %s1355_s29  }
 0x667 PF: > { %s2532_s28 = sld [smem:[#allocation21_spill]]  ;;  %s2533_s11 = sld [smem:[#allocation22_spill]] }
 0x668   : > { %p2535_p13 = scmp.ge.s32.totalorder %s2027_s26, 2 }
 0x66d   : > { %s1381_s17 = sand.u32 1, %s2532_s28   ;;  %p2534_p1 = scmp.ne.s32.totalorder %s2533_s11, 0 }
 0x66e   : > { %s1382_s8 = scalar_lea.sflag [#allocation8], %s1381_s17 }
 0x66f   : > { %p1696_p3 = pnand %p2535_p13, %p2534_p1 }
 0x671   : > { %2002 = dma.done.wait (!%p1696_p3), %s1382_s8, 128  }
 0x672   : > { %2004 = vsyncadd (!%p1696_p3), %s1382_s8, 4294967168  ;;  %s26_s26 = sadd.s32 1, %s2027_s26   ;;  %s2536_s21 = smov %s2011_s22 }
 0x673   : > { %p23_p5 = scmp.ge.s32.totalorder %s26_s26, 4   ;;  %s2537_s22 = smov %s2015_s23 }
 0x674   : > { %s2538_s23 = smov %s2255_s15  ;;  %s2539_s24 = smov %s2023_s25 }
 0x675   : > { %s2540_s25 = smov %s2542_s10  ;;  %25 = sbr.rel (!%p23_p5) target bundleno = 13 (0xd), region = 127 }
 0x67c   :  { %1387 = vsyncpa [#allocation7], 1 }
 0x67d   :  { %1389 = vsyncpa [#allocation7 + $0x1], 1 }
 0x67e   :  { %1390 = vsyncpa [#allocation10], 1 }
 0x67f   :  { %1392 = vsyncpa [#allocation10 + $0x1], 1 }
 0x680   :  { %1393 = vsyncpa [#allocation13], 1 }
 0x681   :  { %1394 = vsyncpa [#allocation8], 1 }
 0x682   :  { %1396 = vsyncpa [#allocation8 + $0x1], 1 }

</bundles_post_ra>
